<compile_context>
chip_gen: v7x
topology: tpu7x:2x2x1
jax: 0.10.0
libtpu: 0.0.40
codegen_flags: <defaults>
</compile_context>

<pallas_src>
import functools

import jax
import jax.numpy as jnp
from jax.experimental import pallas as pl
from jax.experimental.pallas import tpu as pltpu

LANES = 128
_MAX_ROW_TILE = 1024  # 1024 x 128 x f32 = 512 KiB per block (well under VMEM limits)


def _choose_row_tile(rows: int, max_tile: int = _MAX_ROW_TILE) -> int:
    """Largest row tile <= max_tile that is a multiple of 8 and divides rows."""
    if rows <= max_tile:
        return rows
    start = max_tile - (max_tile % 8)
    for t in range(start, 7, -8):
        if rows % t == 0:
            return t
    return rows  # fallback: full-extent block (always legal)


def _mtl_append_kernel(slot_ref, buf_hbm_ref, x_ref, out_ref):
    """Write the x tile into the ring-buffer slot selected by the out index_map."""
    del slot_ref, buf_hbm_ref  # slot consumed by index_map; buffer only aliased
    out_ref[0, :, :] = x_ref[...]


@functools.partial(jax.jit, donate_argnums=(0,))
def mtl_append(buffer, x_flat, slot_arr):
    """buffer: (maxlen, R, 128); x_flat: (R, 128); slot_arr: (1,) int32 slot index."""
    maxlen, rows, cols = buffer.shape
    tile_r = _choose_row_tile(rows)
    n_row_tiles = pl.cdiv(rows, tile_r)

    grid_spec = pltpu.PrefetchScalarGridSpec(
        num_scalar_prefetch=1,
        grid=(n_row_tiles,),
        in_specs=[
            # Ring buffer stays in HBM untouched; it exists only to be aliased.
            pl.BlockSpec(memory_space=pl.ANY),
            # New observation, tiled along rows.
            pl.BlockSpec((tile_r, cols), lambda r, slot_ref: (r, 0)),
        ],
        # Data-dependent slot selection via scalar prefetch: only this slot's
        # blocks are DMA'd back; all other slots keep their (aliased) contents.
        out_specs=pl.BlockSpec(
            (1, tile_r, cols), lambda r, slot_ref: (slot_ref[0], r, 0)),
    )

    return pl.pallas_call(
        _mtl_append_kernel,
        out_shape=jax.ShapeDtypeStruct(buffer.shape, buffer.dtype),
        grid_spec=grid_spec,
        # operand 0 = slot_arr (scalar prefetch), 1 = buffer, 2 = x_flat
        input_output_aliases={1: 0},
        compiler_params=pltpu.CompilerParams(
            dimension_semantics=("parallel",)),
    )(slot_arr, buffer, x_flat)


class MedialTemporalLobe:
    """JAX/Pallas port of the PyTorch MedialTemporalLobe module."""

    @staticmethod
    def get_default_config():
        return {'mtl_max_length': 1}

    def __init__(self, name, config, item_shape, dtype=jnp.float32):
        self._name = name
        self._config = config
        self._item_shape = tuple(item_shape)
        self._dtype = dtype
        self._build()

    def _build(self):
        maxlen = self._config['mtl_max_length']
        n_elem = 1
        for d in self._item_shape:
            n_elem *= d
        assert n_elem % LANES == 0, "flattened item must be a multiple of 128"
        self._rows = n_elem // LANES
        # Deterministic init: empty (zeroed) MTL storage.
        self.mtl_buffer = jnp.zeros((maxlen, self._rows, LANES), self._dtype)
        # Device-side ring pointer (keeps forward jit/scan friendly).
        self._write_ptr = jnp.zeros((1,), jnp.int32)
        self._count = 0  # number of valid items (<= maxlen), host bookkeeping only

    def forward(self, what_where):
        maxlen = self._config['mtl_max_length']
        # Flatten NCHW (or any layout) to lane-dense (rows, 128) — glue only.
        x_flat = jnp.reshape(what_where, (self._rows, LANES)).astype(self._dtype)
        # In-place single-slot append (buffer donated + aliased inside kernel).
        self.mtl_buffer = mtl_append(self.mtl_buffer, x_flat, self._write_ptr)
        self._write_ptr = (self._write_ptr + 1) % maxlen
        self._count = min(self._count + 1, maxlen)
        # Matches torch forward(): no return value.
        return None

    # Convenience accessor for testing (not in original module interface).
    def contents(self):
        return self.mtl_buffer, self._count


if __name__ == "__main__":
    key = jax.random.PRNGKey(0)
    B, C, H, W = 2, 4, 16, 16  # small NCHW-shaped "what_where" input

    # --- Case 1: default config (mtl_max_length = 1) -------------------------
    cfg1 = MedialTemporalLobe.get_default_config()
    m1 = MedialTemporalLobe("mtl", cfg1, item_shape=(B, C, H, W))
    x1 = jax.random.normal(key, (B, C, H, W), dtype=jnp.float32)
    m1.forward(x1)
    buf1, count1 = m1.contents()
    buf1 = jax.block_until_ready(buf1)
    rows = buf1.shape[1]
    assert count1 == 1
    assert bool(jnp.allclose(buf1[0], jnp.reshape(x1, (rows, LANES)))), \
        "MTL slot 0 does not match appended input"

    # --- Case 2: mtl_max_length = 3, exercise slot selection + wraparound ----
    cfg2 = {'mtl_max_length': 3}
    m2 = MedialTemporalLobe("mtl3", cfg2, item_shape=(B, C, H, W))
    keys = jax.random.split(key, 4)
    xs = [jax.random.normal(k, (B, C, H, W), dtype=jnp.float32) for k in keys]
    for x in xs:  # 4 appends into a 3-deep ring: slot 0 overwritten by xs[3]
        m2.forward(x)
    buf2, count2 = m2.contents()
    buf2 = jax.block_until_ready(buf2)
    assert count2 == 3
    assert bool(jnp.allclose(buf2[0], jnp.reshape(xs[3], (rows, LANES))))
    assert bool(jnp.allclose(buf2[1], jnp.reshape(xs[1], (rows, LANES))))
    assert bool(jnp.allclose(buf2[2], jnp.reshape(xs[2], (rows, LANES))))

    print("KERNEL_OK")
</pallas_src>

<mosaic_0001>
module attributes {stable_mosaic.version = 11 : i64} {
  func.func @_mtl_append_kernel(%arg0: i32, %arg1: memref<1xi32, #tpu.memory_space<smem>>, %arg2: memref<1x16x128xf32, #tpu.memory_space<any>>, %arg3: memref<16x128xf32, #tpu.memory_space<vmem>>, %arg4: memref<1x16x128xf32, #tpu.memory_space<vmem>>) attributes {dimension_semantics = [#tpu.dimension_semantics<parallel>], iteration_bounds = array<i64: 1>, scalar_prefetch = 1 : i64, scratch_operands = 0 : i64, tpu.core_type = #tpu.core_type<tc>, window_params = [{}, {transform_indices = @transform_1, window_bounds = array<i64: 16, 128>}, {transform_indices = @transform_2, window_bounds = array<i64: 1, 16, 128>}]} {
    %c0 = arith.constant 0 : index
    %c0_0 = arith.constant 0 : index
    %0 = vector.load %arg3[%c0, %c0_0] : memref<16x128xf32, #tpu.memory_space<vmem>>, vector<16x128xf32>
    %c0_1 = arith.constant 0 : index
    %c0_2 = arith.constant 0 : index
    %c0_3 = arith.constant 0 : index
    %1 = vector.load %arg4[%c0_1, %c0_2, %c0_3] : memref<1x16x128xf32, #tpu.memory_space<vmem>>, vector<1x16x128xf32>
    %2 = vector.shape_cast %1 : vector<1x16x128xf32> to vector<16x128xf32>
    %3 = vector.shape_cast %0 : vector<16x128xf32> to vector<1x16x128xf32>
    tpu.vector_store %arg4[%c0_1, %c0_2, %c0_3], %3 {strides = array<i32>} : memref<1x16x128xf32, #tpu.memory_space<vmem>>, vector<1x16x128xf32>,
    return
  }
  func.func @transform_1(%arg0: i32, %arg1: memref<1xi32, #tpu.memory_space<smem>>) -> (i32, i32) {
    %c0_i32 = arith.constant 0 : i32
    %c0_i32_0 = arith.constant 0 : i32
    return %arg0, %c0_i32 : i32, i32
  }
  func.func @transform_2(%arg0: i32, %arg1: memref<1xi32, #tpu.memory_space<smem>>) -> (i32, i32, i32) {
    %c0 = arith.constant 0 : index
    %0 = memref.load %arg1[%c0] : memref<1xi32, #tpu.memory_space<smem>>
    %c0_i32 = arith.constant 0 : i32
    %c0_i32_0 = arith.constant 0 : i32
    return %0, %arg0, %c0_i32 : i32, i32, i32
  }
}

</mosaic_0001>

<bundles_post_ra>
// kernel: mtl_append.1
= control target key start
LH: loop header
LB: loop body
LE: loop exit
PB: predicated region body
PF: predicated region fallthrough
CT: control target
= control target key end

     0   :  { %9 = vsyncpa [#allocation5], 0  ;;  %s165_s0 = inlined_call_operand.<no memory space> [shape: s32[1], index: 0, kind: input, shape index: {}]   ;;  %s166_s1 = inlined_call_operand.hbm [shape: f32[1,16,128], index: 1, kind: input, shape index: {}, may-alias: {1,3}]   ;;  %s167_s2 = inlined_call_operand.hbm [shape: f32[16,128], index: 2, kind: input, shape index: {}]   ;;  %s168_s3 = inlined_call_operand.hbm [shape: f32[1,16,128], index: 3, kind: output, shape index: {}, may-alias: {1,3}]  }
   0x1   :  { %10 = vsyncpa [#allocation6], 0  ;;  %s111_s12 = smov [#allocation4]   ;;  %s61_s16 = scalar_lea.hbm %s167_s2, 256 }
   0x2   :  { %s16_s13 = sshll.u32 %s111_s12, 4  ;;  %p62_p0 = scmp.ne.s32.totalorder %s167_s2, %s61_s16  ;;  %s17_s13 = int_to_ptr.vmem [resolvable:$true] %s16_s13 }
   0x3   :  { %p65_p1 = scmp.lt.u32.totalorder %s61_s16, %s167_s2 }
   0x5   :  { %p67_p2 = pnand %p65_p1, %p62_p0 }
   0x7   :  { %70 = shalt.err (!%p67_p2)
}
   0x8   :  { %s71_s20 = scalar_lea.vmem %s17_s13, 256  ;;  %p76_p4 = scmp.lt.s32.totalorder %s17_s13, %s17_s13 }
   0x9   :  { %p72_p3 = scmp.ne.s32.totalorder %s17_s13, %s71_s20  ;;  %p77_p5 = scmp.lt.s32.totalorder %s71_s20, %s71_s20 }
   0xb   :  { %p78_p6 = por %p77_p5, %p76_p4 }
   0xd   :  { %p79_p7 = pnand %p78_p6, %p72_p3 }
   0xf   :  { %82 = shalt.err (!%p79_p7)
}
  0x10   :  { %s112_s21 = smov 128   ;;  %s113_s22 = smov 8  }
  0x11   :  { %22 = dma.hbm_to_vmem [thread:$0]  %s167_s2, 256, %s17_s13, [#allocation5], %s112_s21, %s112_s21, %s113_s22  }
  0x12   :  { %107 = dma.done.wait [#allocation5], 256  }
  0x13   :  { %108 = vsyncadd [#allocation5], 4294967040  ;;  %s56_s27 = sshll.u32 %s165_s0, 8  ;;  %s114_s28 = smov [#allocation7]   ;;  %v27_v0 = vld [vmem:[#allocation4] sm:$0xff]  ;;  %v28_v1 = vld [vmem:[#allocation4 + $0x8] sm:$0xff] }
  0x14   :  { %s40_s29 = sshll.u32 %s114_s28, 4  ;;  %s39_s5 = scalar_lea.hbm %s168_s3, %s56_s27  ;;  %29 = vst [vmem:[#allocation7] sm:$0xff] %v27_v0  ;;  %30 = vst [vmem:[#allocation7 + $0x8] sm:$0xff] %v28_v1  ;;  %s41_s29 = int_to_ptr.vmem [resolvable:$true] %s40_s29 }
  0x15   :  { %s83_s6 = scalar_lea.vmem %s41_s29, 256  ;;  %p88_p9 = scmp.lt.s32.totalorder %s41_s29, %s41_s29 }
  0x16   :  { %p84_p8 = scmp.ne.s32.totalorder %s41_s29, %s83_s6  ;;  %p89_p10 = scmp.lt.s32.totalorder %s83_s6, %s83_s6 }
  0x18   :  { %p90_p11 = por %p89_p10, %p88_p9 }
  0x1a   :  { %p91_p12 = pnand %p90_p11, %p84_p8 }
  0x1c   :  { %94 = shalt.err (!%p91_p12)
}
  0x1d   :  { %s95_s2 = scalar_lea.hbm %s39_s5, 256  ;;  %s97_s8 = scalar_lea.hbm %s168_s3, 256 }
  0x1e   :  { %p96_p13 = scmp.ne.s32.totalorder %s39_s5, %s95_s2  ;;  %p98_p0 = scmp.lt.u32.totalorder %s39_s5, %s168_s3 }
  0x1f   :  { %p99_p1 = scmp.lt.u32.totalorder %s97_s8, %s95_s2  ;;  %p101_p3 = scmp.lt.u32.totalorder %s95_s2, %s39_s5 }
  0x21   :  { %p100_p2 = por %p99_p1, %p98_p0 }
  0x23   :  { %p102_p4 = por %p101_p3, %p100_p2 }
  0x25   :  { %p103_p5 = pnand %p102_p4, %p96_p13 }
  0x27   :  { %106 = shalt.err (!%p103_p5)
}
  0x28   :  { %46 = dma.vmem_to_hbm [thread:$0]  %s41_s29, 256, %s39_s5, [#allocation6], %s112_s21, %s112_s21, %s113_s22  }
  0x29   :  { %109 = dma.done.wait [#allocation6], 256  }
  0x2a   :  { %110 = vsyncadd [#allocation6], 4294967040 }
  0x2b   :  { %50 = vsyncpa [#allocation5], 1 }
  0x2c   :  { %51 = vsyncpa [#allocation6], 1 }

</bundles_post_ra>
